<compile_context>
chip_gen: v6e
topology: v6e:2x2x1
jax: 0.10.0
libtpu: 0.0.40
codegen_flags: <defaults>
</compile_context>

<pallas_src>
import jax
import jax.numpy as jnp
from jax import lax
from jax.experimental import pallas as pl
from jax.experimental.pallas import tpu as pltpu

IN_DIM = 64              # in_dim of HeadNet
HID_DIM = 2 * IN_DIM     # 128
OUT_DIM = 4
MAX_BATCH_TILE = 2048    # upper bound on rows per grid step
MIN_GRID_STEPS = 8       # give v7x's 2 TensorCores enough steps to overlap


def _headnet_kernel(x_ref, w1_ref, b1_ref, w2_ref, b2_ref, w3_ref, b3_ref,
                    o_ref):
    f32 = jnp.float32
    bf16 = jnp.bfloat16
    # Matmuls run on the MXU with bf16 inputs and f32 accumulation; bias add
    # and ReLU stay in f32 on the VPU (v5e's VPU has no bf16).
    x = x_ref[...].astype(bf16)                                    # (TB, IN)
    h = jnp.dot(x, w1_ref[...], preferred_element_type=f32) + b1_ref[...]
    h = jnp.maximum(h, 0.0).astype(bf16)                           # (TB, HID)
    h = jnp.dot(h, w2_ref[...], preferred_element_type=f32) + b2_ref[...]
    h = jnp.maximum(h, 0.0).astype(bf16)                           # (TB, IN)
    o_ref[...] = (jnp.dot(h, w3_ref[...], preferred_element_type=f32)
                  + b3_ref[...])                                   # (TB, OUT)


def _round_up(n, m):
    return ((n + m - 1) // m) * m


def make_headnet_forward(params, max_batch_tile=MAX_BATCH_TILE):
    f32 = jnp.float32
    bf16 = jnp.bfloat16
    # PyTorch nn.Linear stores W as (out_features, in_features); transpose
    # once in the wrapper so the kernel's matmuls are plain x @ W on the MXU.
    # Weights go to bf16 (MXU-native); biases stay f32.
    w1 = params['w1'].T.astype(bf16)               # (IN,  HID)
    b1 = params['b1'].reshape(1, -1).astype(f32)   # (1,   HID)
    w2 = params['w2'].T.astype(bf16)               # (HID, IN)
    b2 = params['b2'].reshape(1, -1).astype(f32)   # (1,   IN)
    w3 = params['w3'].T.astype(bf16)               # (IN,  OUT)
    b3 = params['b3'].reshape(1, -1).astype(f32)   # (1,   OUT)

    def forward(x):                                # x: (B, IN_DIM)
        batch = x.shape[0]
        # Tile as large as possible (amortize ~0.35us/step grid overhead and
        # keep the MXU fed with long row streams), but keep >= MIN_GRID_STEPS
        # steps for modest batches.  Always a multiple of 8 (sublane aligned).
        tb = max(8, _round_up(pl.cdiv(batch, MIN_GRID_STEPS), 8))
        tb = min(max_batch_tile, tb)
        grid = (pl.cdiv(batch, tb),)

        def resident(a):   # whole array, VMEM-resident across all grid steps
            return pl.BlockSpec(a.shape, lambda i: (0, 0))

        return pl.pallas_call(
            _headnet_kernel,
            out_shape=jax.ShapeDtypeStruct((batch, OUT_DIM), f32),
            grid=grid,
            in_specs=[pl.BlockSpec((tb, IN_DIM), lambda i: (i, 0)),
                      resident(w1), resident(b1),
                      resident(w2), resident(b2),
                      resident(w3), resident(b3)],
            out_specs=pl.BlockSpec((tb, OUT_DIM), lambda i: (i, 0)),
            compiler_params=pltpu.CompilerParams(
                dimension_semantics=("parallel",)),
        )(x, w1, b1, w2, b2, w3, b3)

    return forward


def reference_headnet(x, p):
    """Pure-JAX (XLA) reference mirroring the PyTorch HeadNet.forward."""
    prec = lax.Precision.HIGHEST
    h = jnp.maximum(jnp.dot(x, p['w1'].T, precision=prec) + p['b1'], 0.0)
    h = jnp.maximum(jnp.dot(h, p['w2'].T, precision=prec) + p['b2'], 0.0)
    return jnp.dot(h, p['w3'].T, precision=prec) + p['b3']


if __name__ == "__main__":
    f32 = jnp.float32
    key = jax.random.PRNGKey(0)
    ks = jax.random.split(key, 7)
    n = jax.random.normal

    # Parameters in PyTorch layout: W is (out_features, in_features).
    params = dict(
        w1=0.1 * n(ks[0], (HID_DIM, IN_DIM), f32),
        b1=0.1 * n(ks[1], (HID_DIM,), f32),
        w2=0.1 * n(ks[2], (IN_DIM, HID_DIM), f32),
        b2=0.1 * n(ks[3], (IN_DIM,), f32),
        w3=0.1 * n(ks[4], (OUT_DIM, IN_DIM), f32),
        b3=0.1 * n(ks[5], (OUT_DIM,), f32),
    )

    B = 2
    x = n(ks[6], (B, IN_DIM), f32)

    forward = jax.jit(make_headnet_forward(params))
    y = forward(x)
    jax.block_until_ready(y)

    ref = reference_headnet(x, params)
    err = float(jnp.max(jnp.abs(y - ref)))
    assert y.shape == (B, OUT_DIM)
    assert bool(jnp.all(jnp.isfinite(y)))
    # bf16 MXU inputs (f32 accumulation) vs a Precision.HIGHEST f32 reference.
    assert err < 3e-2, f"mismatch vs reference: max abs err = {err}"
    print("KERNEL_OK")
</pallas_src>

<mosaic_0001>
module attributes {stable_mosaic.version = 11 : i64} {
  func.func @_headnet_kernel(%arg0: i32, %arg1: memref<8x64xf32, #tpu.memory_space<vmem>>, %arg2: memref<64x128xbf16, #tpu.memory_space<vmem>>, %arg3: memref<1x128xf32, #tpu.memory_space<vmem>>, %arg4: memref<128x64xbf16, #tpu.memory_space<vmem>>, %arg5: memref<1x64xf32, #tpu.memory_space<vmem>>, %arg6: memref<64x4xbf16, #tpu.memory_space<vmem>>, %arg7: memref<1x4xf32, #tpu.memory_space<vmem>>, %arg8: memref<8x4xf32, #tpu.memory_space<vmem>>) attributes {dimension_semantics = [#tpu.dimension_semantics<parallel>], iteration_bounds = array<i64: 1>, scalar_prefetch = 0 : i64, scratch_operands = 0 : i64, tpu.core_type = #tpu.core_type<tc>, window_params = [{transform_indices = @transform_0, window_bounds = array<i64: 8, 64>}, {pipeline_mode = #tpu.pipeline_mode<synchronous>, transform_indices = @transform_1, window_bounds = array<i64: 64, 128>}, {pipeline_mode = #tpu.pipeline_mode<synchronous>, transform_indices = @transform_2, window_bounds = array<i64: 1, 128>}, {pipeline_mode = #tpu.pipeline_mode<synchronous>, transform_indices = @transform_3, window_bounds = array<i64: 128, 64>}, {pipeline_mode = #tpu.pipeline_mode<synchronous>, transform_indices = @transform_4, window_bounds = array<i64: 1, 64>}, {pipeline_mode = #tpu.pipeline_mode<synchronous>, transform_indices = @transform_5, window_bounds = array<i64: 64, 4>}, {pipeline_mode = #tpu.pipeline_mode<synchronous>, transform_indices = @transform_6, window_bounds = array<i64: 1, 4>}, {transform_indices = @transform_7, window_bounds = array<i64: 8, 4>}]} {
    %c0 = arith.constant 0 : index
    %c0_0 = arith.constant 0 : index
    %0 = vector.load %arg1[%c0, %c0_0] : memref<8x64xf32, #tpu.memory_space<vmem>>, vector<8x64xf32>
    %1 = arith.truncf %0 : vector<8x64xf32> to vector<8x64xbf16>
    %c0_1 = arith.constant 0 : index
    %c0_2 = arith.constant 0 : index
    %2 = vector.load %arg2[%c0_1, %c0_2] : memref<64x128xbf16, #tpu.memory_space<vmem>>, vector<64x128xbf16>
    %cst = arith.constant dense<0.000000e+00> : vector<8x128xf32>
    %3 = tpu.matmul %1, %2, %cst {dimension_numbers = #tpu.dot_dimension_numbers<[1], [0], [0], [1], [0, 0, 1, 1], [], []>} : vector<8x64xbf16>, vector<64x128xbf16>, vector<8x128xf32> -> vector<8x128xf32>
    %c0_3 = arith.constant 0 : index
    %c0_4 = arith.constant 0 : index
    %4 = vector.load %arg3[%c0_3, %c0_4] : memref<1x128xf32, #tpu.memory_space<vmem>>, vector<1x128xf32>
    %5 = vector.broadcast %4 : vector<1x128xf32> to vector<8x128xf32>
    %6 = arith.addf %3, %5 : vector<8x128xf32>
    %cst_5 = arith.constant 0.000000e+00 : f32
    %7 = vector.broadcast %cst_5 : f32 to vector<8x128xf32>
    %8 = arith.maximumf %6, %7 : vector<8x128xf32>
    %9 = arith.truncf %8 : vector<8x128xf32> to vector<8x128xbf16>
    %c0_6 = arith.constant 0 : index
    %c0_7 = arith.constant 0 : index
    %10 = vector.load %arg4[%c0_6, %c0_7] : memref<128x64xbf16, #tpu.memory_space<vmem>>, vector<128x64xbf16>
    %cst_8 = arith.constant dense<0.000000e+00> : vector<8x64xf32>
    %11 = tpu.matmul %9, %10, %cst_8 {dimension_numbers = #tpu.dot_dimension_numbers<[1], [0], [0], [1], [0, 0, 1, 1], [], []>} : vector<8x128xbf16>, vector<128x64xbf16>, vector<8x64xf32> -> vector<8x64xf32>
    %c0_9 = arith.constant 0 : index
    %c0_10 = arith.constant 0 : index
    %12 = vector.load %arg5[%c0_9, %c0_10] : memref<1x64xf32, #tpu.memory_space<vmem>>, vector<1x64xf32>
    %13 = vector.broadcast %12 : vector<1x64xf32> to vector<8x64xf32>
    %14 = arith.addf %11, %13 : vector<8x64xf32>
    %cst_11 = arith.constant 0.000000e+00 : f32
    %15 = vector.broadcast %cst_11 : f32 to vector<8x64xf32>
    %16 = arith.maximumf %14, %15 : vector<8x64xf32>
    %17 = arith.truncf %16 : vector<8x64xf32> to vector<8x64xbf16>
    %c0_12 = arith.constant 0 : index
    %c0_13 = arith.constant 0 : index
    %18 = vector.load %arg6[%c0_12, %c0_13] : memref<64x4xbf16, #tpu.memory_space<vmem>>, vector<64x4xbf16>
    %cst_14 = arith.constant dense<0.000000e+00> : vector<8x4xf32>
    %19 = tpu.matmul %17, %18, %cst_14 {dimension_numbers = #tpu.dot_dimension_numbers<[1], [0], [0], [1], [0, 0, 1, 1], [], []>} : vector<8x64xbf16>, vector<64x4xbf16>, vector<8x4xf32> -> vector<8x4xf32>
    %c0_15 = arith.constant 0 : index
    %c0_16 = arith.constant 0 : index
    %20 = vector.load %arg7[%c0_15, %c0_16] : memref<1x4xf32, #tpu.memory_space<vmem>>, vector<1x4xf32>
    %21 = vector.broadcast %20 : vector<1x4xf32> to vector<8x4xf32>
    %22 = arith.addf %19, %21 : vector<8x4xf32>
    %c0_17 = arith.constant 0 : index
    %c0_18 = arith.constant 0 : index
    %23 = vector.load %arg8[%c0_17, %c0_18] : memref<8x4xf32, #tpu.memory_space<vmem>>, vector<8x4xf32>
    tpu.vector_store %arg8[%c0_17, %c0_18], %22 {strides = array<i32>} : memref<8x4xf32, #tpu.memory_space<vmem>>, vector<8x4xf32>,
    return
  }
  func.func @transform_0(%arg0: i32) -> (i32, i32) {
    %c0_i32 = arith.constant 0 : i32
    %c0_i32_0 = arith.constant 0 : i32
    return %arg0, %c0_i32 : i32, i32
  }
  func.func @transform_1(%arg0: i32) -> (i32, i32) {
    %c0_i32 = arith.constant 0 : i32
    %c0_i32_0 = arith.constant 0 : i32
    %c0_i32_1 = arith.constant 0 : i32
    return %c0_i32, %c0_i32_0 : i32, i32
  }
  func.func @transform_2(%arg0: i32) -> (i32, i32) {
    %c0_i32 = arith.constant 0 : i32
    %c0_i32_0 = arith.constant 0 : i32
    %c0_i32_1 = arith.constant 0 : i32
    return %c0_i32, %c0_i32_0 : i32, i32
  }
  func.func @transform_3(%arg0: i32) -> (i32, i32) {
    %c0_i32 = arith.constant 0 : i32
    %c0_i32_0 = arith.constant 0 : i32
    %c0_i32_1 = arith.constant 0 : i32
    return %c0_i32, %c0_i32_0 : i32, i32
  }
  func.func @transform_4(%arg0: i32) -> (i32, i32) {
    %c0_i32 = arith.constant 0 : i32
    %c0_i32_0 = arith.constant 0 : i32
    %c0_i32_1 = arith.constant 0 : i32
    return %c0_i32, %c0_i32_0 : i32, i32
  }
  func.func @transform_5(%arg0: i32) -> (i32, i32) {
    %c0_i32 = arith.constant 0 : i32
    %c0_i32_0 = arith.constant 0 : i32
    %c0_i32_1 = arith.constant 0 : i32
    return %c0_i32, %c0_i32_0 : i32, i32
  }
  func.func @transform_6(%arg0: i32) -> (i32, i32) {
    %c0_i32 = arith.constant 0 : i32
    %c0_i32_0 = arith.constant 0 : i32
    %c0_i32_1 = arith.constant 0 : i32
    return %c0_i32, %c0_i32_0 : i32, i32
  }
  func.func @transform_7(%arg0: i32) -> (i32, i32) {
    %c0_i32 = arith.constant 0 : i32
    %c0_i32_0 = arith.constant 0 : i32
    return %arg0, %c0_i32 : i32, i32
  }
}

</mosaic_0001>

<bundles_post_ra>
// kernel: forward.1
= control target key start
LH: loop header
LB: loop body
LE: loop exit
PB: predicated region body
PF: predicated region fallthrough
CT: control target
= control target key end

     0   :  { %12 = vsyncpa [#allocation3], 0  ;;  %s700_s0 = inlined_call_operand.hbm [shape: f32[2,64], index: 0, kind: input, shape index: {}]   ;;  %s701_s1 = inlined_call_operand.hbm [shape: bf16[64,128], index: 1, kind: input, shape index: {}]   ;;  %s702_s2 = inlined_call_operand.vmem [shape: f32[1,128], index: 2, kind: input, shape index: {}]   ;;  %s703_s3 = inlined_call_operand.hbm [shape: bf16[128,64], index: 3, kind: input, shape index: {}]   ;;  %s704_s4 = inlined_call_operand.vmem [shape: f32[1,64], index: 4, kind: input, shape index: {}]   ;;  %s705_s5 = inlined_call_operand.hbm [shape: bf16[64,4], index: 5, kind: input, shape index: {}]   ;;  %s706_s6 = inlined_call_operand.vmem [shape: f32[1,4], index: 6, kind: input, shape index: {}]   ;;  %s707_s7 = inlined_call_operand.hbm [shape: f32[2,4], index: 7, kind: output, shape index: {}]  }
   0x1   :  { %13 = vsyncpa [#allocation6], 0 }
   0x2   :  { %14 = vsyncpa [#allocation9], 0 }
   0x3   :  { %15 = vsyncpa [#allocation4], 0 }
   0x4   :  { %20 = vsyncadd [#allocation3], 96  ;;  %s605_s24 = smov [#allocation5]  }
   0x5   :  { %s33_s25 = sshll.u32 %s605_s24, 4  ;;  %s34_s25 = int_to_ptr.vmem [resolvable:$true] %s33_s25 }
   0x6   :  { %s505_s26 = scalar_lea.vmem %s34_s25, 512  ;;  %p510_p1 = scmp.lt.s32.totalorder %s34_s25, %s34_s25 }
   0x7   :  { %p506_p0 = scmp.ne.s32.totalorder %s34_s25, %s505_s26  ;;  %p511_p2 = scmp.lt.s32.totalorder %s505_s26, %s505_s26 }
   0x9   :  { %p512_p3 = por %p511_p2, %p510_p1 }
   0xb   :  { %p513_p4 = pnand %p512_p3, %p506_p0 }
   0xd   :  { %516 = shalt.err (!%p513_p4)
}
   0xe   :  { %s606_s27 = smov 64   ;;  %s607_s28 = smov 4  }
   0xf   :  { %39 = dma.hbm_to_vmem [thread:$0]  %s701_s1, 512, %s34_s25, [#allocation6], %s606_s27, %s606_s27, %s607_s28  }
  0x10   :  { %s608_s8 = smov [#allocation2]  }
  0x11   :  { %s21_s9 = sshll.u32 %s608_s8, 4  ;;  %s22_s9 = int_to_ptr.vmem [resolvable:$true] %s21_s9 }
  0x12   :  { %s525_s10 = scalar_lea.vmem %s22_s9, 32  ;;  %s529_s11 = scalar_lea.vmem %s22_s9, 128 }
  0x13   :  { %p526_p5 = scmp.ne.s32.totalorder %s22_s9, %s525_s10  ;;  %p530_p6 = scmp.lt.s32.totalorder %s22_s9, %s22_s9 }
  0x14   :  { %p531_p7 = scmp.lt.s32.totalorder %s529_s11, %s525_s10 }
  0x16   :  { %p532_p8 = por %p531_p7, %p530_p6 }
  0x18   :  { %p533_p9 = pnand %p532_p8, %p526_p5 }
  0x1a   :  { %536 = shalt.err (!%p533_p9)
}
  0x1b   :  { %s609_s12 = smov 32   ;;  %s610_s13 = smov 2  }
  0x1c   :  { %27 = dma.hbm_to_vmem [thread:$0]  %s700_s0, 32, %s22_s9, [#allocation3], %s609_s12, %s609_s12, %s610_s13  }
  0x1d   :  { %s611_s1 = smov [#allocation7]   ;;  %s612_s17 = smov [#allocation8]  }
  0x1e   :  { %s47_s16 = sshll.u32 %s611_s1, 4  ;;  %s61_s18 = sshll.u32 %s612_s17, 4  ;;  %s48_s16 = int_to_ptr.vmem [resolvable:$true] %s47_s16  ;;  %s62_s18 = int_to_ptr.vmem [resolvable:$true] %s61_s18 }
  0x1f   :  { %s545_s19 = scalar_lea.vmem %s48_s16, 1024  ;;  %p550_p11 = scmp.lt.s32.totalorder %s48_s16, %s48_s16 }
  0x20   :  { %p546_p10 = scmp.ne.s32.totalorder %s48_s16, %s545_s19  ;;  %p551_p12 = scmp.lt.s32.totalorder %s545_s19, %s545_s19 }
  0x22   :  { %p552_p13 = por %p551_p12, %p550_p11 }
  0x24   :  { %p553_p0 = pnand %p552_p13, %p546_p10 }
  0x26   :  { %556 = shalt.err (!%p553_p0)
}
  0x27   :  { %53 = dma.hbm_to_vmem [thread:$0]  %s703_s3, 1024, %s48_s16, [#allocation6], %s606_s27, %s606_s27, %s607_s28  }
  0x28   :  { %s565_s0 = scalar_lea.vmem %s62_s18, 512  ;;  %p570_p2 = scmp.lt.s32.totalorder %s62_s18, %s62_s18 }
  0x29   :  { %p566_p1 = scmp.ne.s32.totalorder %s62_s18, %s565_s0  ;;  %p571_p3 = scmp.lt.s32.totalorder %s565_s0, %s565_s0 }
  0x2b   :  { %p572_p4 = por %p571_p3, %p570_p2 }
  0x2d   :  { %p573_p5 = pnand %p572_p4, %p566_p1 }
  0x2f   :  { %576 = shalt.err (!%p573_p5)
}
  0x30   :  { %67 = dma.hbm_to_vmem [thread:$0]  %s705_s5, 512, %s62_s18, [#allocation9], %s606_s27, %s606_s27, %s607_s28  }
  0x31   :  { %597 = dma.done.wait [#allocation3], 128  }
  0x32   :  { %598 = vsyncadd [#allocation3], 4294967168 }
  0x33   :  { %599 = dma.done.wait [#allocation6], 1536  }
  0x34   :  { %600 = vsyncadd [#allocation6], 4294965760 }
  0x35   :  { %601 = dma.done.wait [#allocation9], 512  }
  0x36   :  { %602 = vsyncadd [#allocation9], 4294966784  ;;  %v613_v0 = vmov 0.0   ;;  %vm614_vm0 = vmmov 0   ;;  %v481_v1 = vld [vmem:[#allocation5 + $0x18] sm:$0xff]   ;;  %v482_v2 = vld [vmem:[#allocation5 + $0x10] sm:$0xff]  }
  0x37   :  { %426 = vmatprep.subr.bf16.mxu0 %v613_v0  ;;  %434 = vmatprep.mubr.msk.bf16.mxu0 %vm614_vm0, %v613_v0  ;;  %v485_v3 = vld [vmem:[#allocation7 + $0x38] sm:$0xff]   ;;  %v483_v4 = vld [vmem:[#allocation5 + $0x8] sm:$0xff]   ;;  %v486_v5 = vld [vmem:[#allocation7 + $0x30] sm:$0xff]   ;;  %vm124_vm1 = vcmask 523264   ;;  %vm365_vm2 = vcmask 31744  }
  0x38   :  { %438 = vmatprep.subr.bf16.mxu1 %v613_v0  ;;  %454 = vmatprep.mubr.msk.bf16.mxu1 %vm614_vm0, %v613_v0  ;;  %v484_v6 = vld [vmem:[#allocation5] sm:$0xff]   ;;  %v83_v7 = vld [vmem:[#allocation2] sm:$0xff]  ;;  %v487_v8 = vld [vmem:[#allocation7 + $0x28] sm:$0xff]  }
  0x39   :  { %427 = vmatpush3.bf16.msra.mxu0 %v481_v1  ;;  %439 = vmatpush3.bf16.msra.mxu1 %v485_v3  ;;  %v84_v9 = vpack.c.bf16 %v83_v7, %v83_v7  ;;  %v488_v10 = vld [vmem:[#allocation7 + $0x20] sm:$0xff]   ;;  %v489_v11 = vld [vmem:[#allocation7 + $0x18] sm:$0xff]   ;;  %v490_v12 = vld [vmem:[#allocation7 + $0x10] sm:$0xff]  }
  0x3a   :  { %428 = vmatprep.subr.bf16.mxu0 %v613_v0  ;;  %440 = vmatprep.subr.bf16.mxu1 %v613_v0  ;;  %v491_v13 = vld [vmem:[#allocation7 + $0x8] sm:$0xff]   ;;  %v492_v14 = vld [vmem:[#allocation7] sm:$0xff]   ;;  %v493_v15 = vld [vmem:[#allocation8 + $0x18] sm:$0xff]  }
  0x3b   :  { %v494_v16 = vld [vmem:[#allocation8 + $0x10] sm:$0xff]   ;;  %v386_v17 = vld [vmem:[%s702_s2] ss:$0 sm:$0xff]  ;;  %v495_v25 = vld [vmem:[#allocation8 + $0x8] sm:$0xff]  }
  0x3c   :  { %v496_v26 = vld [vmem:[#allocation8] sm:$0xff]   ;;  %v392_v27 = vld [vmem:[%s704_s4] ss:$0 sm:$0xff] }
  0x3d   :  { %429 = vmatpush3.bf16.msra.mxu0 %v482_v2  ;;  %441 = vmatpush3.bf16.msra.mxu1 %v486_v5  ;;  %v401_v35 = vld [vmem:[%s706_s6] ss:$0 sm:$0xff] }
  0x3e   :  { %430 = vmatprep.subr.bf16.mxu0 %v613_v0  ;;  %442 = vmatprep.subr.bf16.mxu1 %v613_v0 }
  0x41   :  { %431 = vmatpush3.bf16.msra.mxu0 %v483_v4  ;;  %443 = vmatpush3.bf16.msra.mxu1 %v487_v8 }
  0x42   :  { %432 = vmatprep.subr.bf16.mxu0 %v613_v0  ;;  %444 = vmatprep.subr.bf16.mxu1 %v613_v0 }
  0x45   :  { %433 = vmatpush3.bf16.msra.mxu0 %v484_v6  ;;  %445 = vmatpush3.bf16.msra.mxu1 %v488_v10 }
  0x46   :  { %458 = vmatprep.subr.bf16.mxu0 %v613_v0  ;;  %446 = vmatprep.subr.bf16.mxu1 %v613_v0 }
  0x48   :  { %435 = vmatmul.mubr.msk.bf16.vlgmr.msra.gmra.mxu0 %vm124_vm1, %v84_v9 }
  0x49   :  { %466 = vmatprep.mubr.msk.bf16.mxu0 %vm614_vm0, %v613_v0  ;;  %447 = vmatpush3.bf16.msra.mxu1 %v489_v11 }
  0x4a   :  { %448 = vmatprep.subr.bf16.mxu1 %v613_v0  ;;  %459 = vmatpush3.bf16.msra.mxu0 %v493_v15 }
  0x4b   :  { %460 = vmatprep.subr.bf16.mxu0 %v613_v0 }
  0x4d   :  { %449 = vmatpush3.bf16.msra.mxu1 %v490_v12 }
  0x4e   :  { %450 = vmatprep.subr.bf16.mxu1 %v613_v0  ;;  %461 = vmatpush3.bf16.msra.mxu0 %v494_v16 }
  0x4f   :  { %462 = vmatprep.subr.bf16.mxu0 %v613_v0 }
  0x51   :  { %451 = vmatpush3.bf16.msra.mxu1 %v491_v13 }
  0x52   :  { %452 = vmatprep.subr.bf16.mxu1 %v613_v0  ;;  %463 = vmatpush3.bf16.msra.mxu0 %v495_v25 }
  0x53   :  { %464 = vmatprep.subr.bf16.mxu0 %v613_v0 }
  0x55   :  { %453 = vmatpush3.bf16.msra.mxu1 %v492_v14 }
  0x56   :  { %465 = vmatpush3.bf16.msra.mxu0 %v496_v26 }
 0x108   :  { %v162_v18 = vpop.f32.mrf.mxu0 }
 0x109   :  { %v163_v19 = vadd.f32 %v386_v17, %v162_v18 }
 0x10a   :  { %v436_v20 = vpop.f32.mrf.mxu0 }
 0x10b   :  { %v168_v21 = vmax.f32 %v163_v19, 0.0 }
 0x10c   :  { %v165_v22 = vpop.f32.mrf.mxu0 }
 0x10d   :  { %v169_v23 = vpack.c.bf16 %v168_v21, %v168_v21 }
 0x10e   :  { %v437_v24 = vpop.f32.mrf.mxu0 }
 0x10f   :  { %455 = vmatmul.mubr.bf16.vlgmr.msra.gmra.mxu1 %v169_v23 }
 0x1cf   :  { %v275_v28 = vpop.f32.mrf.mxu1 }
 0x1d0   :  { %v276_v29 = vadd.f32 %v392_v27, %v275_v28 }
 0x1d1   :  { %v456_v30 = vpop.f32.mrf.mxu1 }
 0x1d2   :  { %v281_v31 = vmax.f32 %v276_v29, 0.0 }
 0x1d3   :  { %v278_v32 = vpop.f32.mrf.mxu1 }
 0x1d4   :  { %v282_v33 = vpack.c.bf16 %v281_v31, %v281_v31 }
 0x1d5   :  { %v457_v34 = vpop.f32.mrf.mxu1 }
 0x1d6   :  { %467 = vmatmul.mubr.msk.bf16.vlgmr.msra.gmra.mxu0 %vm124_vm1, %v282_v33 }
 0x296   :  { %v359_v36 = vpop.f32.mrf.mxu0 }
 0x297   :  { %v360_v37 = vadd.f32 %v401_v35, %v359_v36 }
 0x298   :  { %v468_v38 = vpop.f32.mrf.mxu0 }
 0x299   :  { %366 = vst.msk [vmem:[#allocation10] sm:$0xff] %vm365_vm2, %v360_v37 }
 0x29a   :  { %v362_v39 = vpop.f32.mrf.mxu0 }
 0x29c   :  { %v469_v40 = vpop.f32.mrf.mxu0 }
 0x29d   :  { %371 = vsyncadd [#allocation4], 96  ;;  %s615_s4 = smov [#allocation10]  }
 0x29e   :  { %s372_s27 = sshll.u32 %s615_s4, 4  ;;  %s373_s27 = int_to_ptr.vmem [resolvable:$true] %s372_s27 }
 0x29f   :  { %s577_s28 = scalar_lea.vmem %s373_s27, 32  ;;  %s581_s29 = scalar_lea.vmem %s373_s27, 128 }
 0x2a0   :  { %p578_p6 = scmp.ne.s32.totalorder %s373_s27, %s577_s28  ;;  %p582_p7 = scmp.lt.s32.totalorder %s373_s27, %s373_s27 }
 0x2a1   :  { %p583_p8 = scmp.lt.s32.totalorder %s581_s29, %s577_s28 }
 0x2a3   :  { %p584_p9 = por %p583_p8, %p582_p7 }
 0x2a5   :  { %p585_p10 = pnand %p584_p9, %p578_p6 }
 0x2a7   :  { %588 = shalt.err (!%p585_p10)
}
 0x2a8   :  { %378 = dma.vmem_to_hbm [thread:$0]  %s373_s27, 32, %s707_s7, [#allocation4], %s609_s12, %s609_s12, %s610_s13  }
 0x2a9   :  { %603 = dma.done.wait [#allocation4], 128  }
 0x2aa   :  { %604 = vsyncadd [#allocation4], 4294967168 }
 0x2ab   :  { %382 = vsyncpa [#allocation3], 1 }
 0x2ac   :  { %383 = vsyncpa [#allocation6], 1 }
 0x2ad   :  { %384 = vsyncpa [#allocation9], 1 }
 0x2ae   :  { %385 = vsyncpa [#allocation4], 1 }

</bundles_post_ra>
